<compile_context>
chip_gen: v7x
topology: tpu7x:2x2x1
jax: 0.10.0
libtpu: 0.0.40
codegen_flags: <defaults>
</compile_context>

<pallas_src>
import functools

import jax
import jax.numpy as jnp
import numpy as np
from jax import lax
from jax.experimental import pallas as pl
from jax.experimental.pallas import tpu as pltpu

EPS = 1e-5
NEG_SLOPE = 0.2
LANE = 128


def _vmem_limit_bytes():
    """Generation-dependent scoped-VMEM request (leave headroom for compiler scratch)."""
    try:
        info = pltpu.get_tpu_info()
        phys = int(getattr(info, "vmem_capacity_bytes", 64 << 20))
    except Exception:
        phys = 64 << 20
    return int(min(max(phys - (16 << 20), 32 << 20), 100 << 20))


def _pick_tile(t, c, *, target_bytes, cap):
    """Largest lane-aligned tile dividing T whose (C, tile) f32 block is ~target_bytes."""
    if t % LANE != 0:
        return t                                    # full row is always a legal block
    want = (target_bytes // (c * 4)) // LANE * LANE
    want = max(LANE, min(want, cap, t))
    best = LANE
    m = LANE
    while m <= want:
        if t % m == 0:
            best = m
        m += LANE
    return best


def _conv_stats_kernel(xpad_hbm, w_ref, b_ref, z_ref, stats_ref,
                       win_buf, copy_sem, sum_sc, sq_sc, *,
                       dilation, tile_t, halo, n_t):
    """Pass 1: fused (dilated conv -> 1x1 conv) + residual + LeakyReLU + BN sum/sumsq.

    xpad_hbm : (B, C, T+halo) zero-padded input, left in HBM (manual halo-window DMA)
    w_ref    : (3, C, C)      fused weights  w1 @ w_dil[:,:,k]  per tap k
    b_ref    : (C, 1)         fused bias     w1 @ b_dil + b1
    z_ref    : (1, C, tile_t) pre-BN activation tile (auto-pipelined output)
    stats_ref: (1, C, 2)      per-batch [sum, sumsq], written once at the last tile
    win_buf  : (2, C, tile_t+halo) VMEM double buffer for the halo window
    copy_sem : DMA((2,))
    sum_sc/sq_sc : (C, 1) f32 VMEM accumulators
    """
    b = pl.program_id(0)
    j = pl.program_id(1)
    d = dilation
    tt = tile_t
    W = tt + halo
    slot = j % 2

    def window_copy(jj, s):
        # (C, tile_t + halo) halo window of batch b's padded row, HBM -> VMEM slot s.
        return pltpu.make_async_copy(
            xpad_hbm.at[b, :, pl.ds(jj * tt, W)], win_buf.at[s], copy_sem.at[s])

    @pl.when(j == 0)
    def _():
        window_copy(0, 0).start()                 # prime first window of this batch
        sum_sc[...] = jnp.zeros_like(sum_sc)
        sq_sc[...] = jnp.zeros_like(sq_sc)

    # Prefetch the next window into the other slot. Per-batch-local only, so it stays
    # correct when the b axis is sharded across TensorCores ("parallel").
    @pl.when(j + 1 < n_t)
    def _():
        window_copy(j + 1, 1 - slot).start()

    window_copy(j, slot).wait()                   # wait for this step's window

    win = win_buf.at[slot]                        # (C, tile_t + halo) VMEM view
    cdt = w_ref.dtype
    x0 = win[:, 0:tt]
    x1 = win[:, d:d + tt]                         # == original x tile (residual)
    x2 = win[:, 2 * d:2 * d + tt]

    # Dilated conv (3 taps) with the 1x1 conv pre-fused: three accumulating MXU dots,
    # no (3C, tile_t) concat materialized.
    z = jnp.dot(w_ref[0], x0.astype(cdt), preferred_element_type=jnp.float32)
    z = z + jnp.dot(w_ref[1], x1.astype(cdt), preferred_element_type=jnp.float32)
    z = z + jnp.dot(w_ref[2], x2.astype(cdt), preferred_element_type=jnp.float32)
    z = z + b_ref[...] + x1                       # fused bias + residual (f32)
    z = jnp.where(z >= 0, z, NEG_SLOPE * z)       # LeakyReLU(0.2)
    z_ref[0] = z.astype(z_ref.dtype)

    # BatchNorm partial statistics, accumulated in VMEM scratch (no width-2 output RMW
    # per step); single (C, 2) store per batch.
    # TODO(synk): for very large B*T consider a shifted sum-of-squares to avoid
    # E[z^2]-mean^2 cancellation if tolerances tighten.
    sum_sc[...] += jnp.sum(z, axis=1, keepdims=True)
    sq_sc[...] += jnp.sum(z * z, axis=1, keepdims=True)

    @pl.when(j == n_t - 1)
    def _():
        stats_ref[0] = jnp.concatenate([sum_sc[...], sq_sc[...]], axis=1)


def _bn_apply_kernel(z_ref, scale_ref, shift_ref, out_ref):
    """Pass 2: out = z * scale + shift (BN mean/var and gamma/beta pre-folded)."""
    out_ref[...] = (z_ref[...] * scale_ref[...] + shift_ref[...]).astype(out_ref.dtype)


def dilated_block(x, params, dilation, *, tile_t=None, matmul_dtype=jnp.float32):
    """Pallas forward of DilatedBlock. x: (B, C, T) float32."""
    B, C, T = x.shape
    d = int(dilation)
    assert d >= 1
    halo = ((2 * d + LANE - 1) // LANE) * LANE      # lane-aligned halo covering both taps
    tt = tile_t if tile_t is not None else _pick_tile(T, C, target_bytes=2 << 20, cap=4096)
    assert T % tt == 0, "tile_t must divide T"
    n_t = T // tt
    Tp = T + halo
    vmem_limit = _vmem_limit_bytes()

    # Zero-pad time axis: left pad d (conv padding), right pad halo-d (conv pad + window).
    xpad = jnp.pad(x, ((0, 0), (0, 0), (d, halo - d)))

    # Fuse the 1x1 conv into the dilated conv (exact: both linear, no nonlinearity between).
    hp = lax.Precision.HIGHEST
    w_dil = params["w_dil"]                         # (C, C, 3)  [out, in, tap]
    w1 = params["w1"][:, :, 0]                      # (C, C)
    w_eff = jnp.stack(
        [jnp.matmul(w1, w_dil[:, :, k], precision=hp) for k in range(3)], axis=0
    ).astype(matmul_dtype)                          # (3, C, C)
    b_eff = (jnp.matmul(w1, params["b_dil"][:, None], precision=hp)[:, 0]
             + params["b1"]).reshape(C, 1).astype(jnp.float32)
    # TODO(synk): for very large C (>~1024) the resident (3,C,C) weight block needs its own
    # channel tiling; out of scope here.

    # ---- pass 1: conv + residual + leaky-relu + partial BN stats --------------------------
    kernel1 = functools.partial(_conv_stats_kernel, dilation=d, tile_t=tt, halo=halo, n_t=n_t)
    z, stats = pl.pallas_call(
        kernel1,
        out_shape=(jax.ShapeDtypeStruct((B, C, T), jnp.float32),
                   jax.ShapeDtypeStruct((B, C, 2), jnp.float32)),
        grid=(B, n_t),
        in_specs=[pl.BlockSpec(memory_space=pl.ANY),            # x stays in HBM; manual DMA
                  pl.BlockSpec((3, C, C), lambda b, j: (0, 0, 0)),
                  pl.BlockSpec((C, 1), lambda b, j: (0, 0))],
        out_specs=(pl.BlockSpec((1, C, tt), lambda b, j: (b, 0, j)),
                   pl.BlockSpec((1, C, 2), lambda b, j: (b, 0, 0))),
        scratch_shapes=[pltpu.VMEM((2, C, tt + halo), jnp.float32),
                        pltpu.SemaphoreType.DMA((2,)),
                        pltpu.VMEM((C, 1), jnp.float32),
                        pltpu.VMEM((C, 1), jnp.float32)],
        compiler_params=pltpu.CompilerParams(
            dimension_semantics=("parallel", "arbitrary"),
            vmem_limit_bytes=vmem_limit),
    )(xpad, w_eff, b_eff)

    # ---- tiny O(C) stat reduction + fold BN (train-mode biased variance) into scale/shift --
    n = B * T
    total = jnp.sum(stats, axis=0)                  # (C, 2)
    mean = total[:, 0] / n
    var = total[:, 1] / n - mean * mean
    inv = lax.rsqrt(var + EPS)
    scale = (params["gamma"] * inv).reshape(1, C, 1)
    shift = (params["beta"] - params["gamma"] * mean * inv).reshape(1, C, 1)
    # TODO(synk): PyTorch BatchNorm1d (train) also updates running_mean/running_var
    # (unbiased); expose (mean, var) here if those side-effect stats are needed downstream.

    # ---- pass 2: normalize in place over z (HBM-bound elementwise, big lane-dense blocks) --
    tile2 = _pick_tile(T, C, target_bytes=4 << 20, cap=16384)
    n2 = T // tile2
    alias = {0: 0} if z.dtype == x.dtype else {}
    out = pl.pallas_call(
        _bn_apply_kernel,
        out_shape=jax.ShapeDtypeStruct((B, C, T), x.dtype),
        grid=(B, n2),
        in_specs=[pl.BlockSpec((1, C, tile2), lambda b, j: (b, 0, j)),
                  pl.BlockSpec((1, C, 1), lambda b, j: (0, 0, 0)),
                  pl.BlockSpec((1, C, 1), lambda b, j: (0, 0, 0))],
        out_specs=pl.BlockSpec((1, C, tile2), lambda b, j: (b, 0, j)),
        input_output_aliases=alias,
        compiler_params=pltpu.CompilerParams(
            dimension_semantics=("parallel", "parallel"),
            vmem_limit_bytes=vmem_limit),
    )(z, scale, shift)
    return out


def dilated_block_ref(x, params, dilation):
    """Pure-JAX reference (mirrors PyTorch semantics) for verification."""
    d = dilation
    dn = ("NCH", "OIH", "NCH")
    y = lax.conv_general_dilated(x, params["w_dil"], window_strides=(1,),
                                 padding=((d, d),), rhs_dilation=(d,),
                                 dimension_numbers=dn)
    y = y + params["b_dil"][None, :, None]
    z = lax.conv_general_dilated(y, params["w1"], window_strides=(1,),
                                 padding=((0, 0),), dimension_numbers=dn)
    z = z + params["b1"][None, :, None]
    z = z + x
    z = jnp.where(z >= 0, z, NEG_SLOPE * z)
    mean = z.mean(axis=(0, 2), keepdims=True)
    var = ((z - mean) ** 2).mean(axis=(0, 2), keepdims=True)
    z = (z - mean) / jnp.sqrt(var + EPS)
    return params["gamma"][None, :, None] * z + params["beta"][None, :, None]


def init_params(key, channels):
    """Deterministic init matching PyTorch shapes (Conv1d / BatchNorm1d)."""
    k1, k2, k3, k4 = jax.random.split(key, 4)
    bound3 = 1.0 / np.sqrt(channels * 3)   # dilated conv fan_in = C*3
    bound1 = 1.0 / np.sqrt(channels * 1)   # 1x1 conv fan_in = C*1
    return {
        "w_dil": jax.random.uniform(k1, (channels, channels, 3), jnp.float32,
                                    -bound3, bound3),
        "b_dil": jax.random.uniform(k2, (channels,), jnp.float32, -bound3, bound3),
        "w1": jax.random.uniform(k3, (channels, channels, 1), jnp.float32,
                                 -bound1, bound1),
        "b1": jax.random.uniform(k4, (channels,), jnp.float32, -bound1, bound1),
        "gamma": jnp.ones((channels,), jnp.float32),
        "beta": jnp.zeros((channels,), jnp.float32),
    }


if __name__ == "__main__":
    B, C, T = 2, 8, 1024   # C multiple of 8 (sublane), T multiple of 128 (lane)

    key = jax.random.PRNGKey(0)
    kx, kp = jax.random.split(key)
    x = jax.random.normal(kx, (B, C, T), jnp.float32)
    params = init_params(kp, C)

    # Default byte-targeted tiling (single tile per row here), dilation = 3.
    out = jax.block_until_ready(dilated_block(x, params, 3))
    ref = jax.block_until_ready(dilated_block_ref(x, params, 3))
    np.testing.assert_allclose(np.asarray(out), np.asarray(ref), rtol=1e-4, atol=1e-4)

    # Forced multi-tile path (exercises halo-window double buffering + stats accumulation).
    out2 = jax.block_until_ready(dilated_block(x, params, 1, tile_t=256))
    ref2 = jax.block_until_ready(dilated_block_ref(x, params, 1))
    np.testing.assert_allclose(np.asarray(out2), np.asarray(ref2), rtol=1e-4, atol=1e-4)

    print("KERNEL_OK")
</pallas_src>

<mosaic_0001>
module attributes {stable_mosaic.version = 11 : i64} {
  func.func @_conv_stats_kernel(%arg0: i32, %arg1: i32, %arg2: memref<2x8x1152xf32, #tpu.memory_space<any>>, %arg3: memref<3x8x8xf32, #tpu.memory_space<vmem>>, %arg4: memref<8x1xf32, #tpu.memory_space<vmem>>, %arg5: memref<1x8x1024xf32, #tpu.memory_space<vmem>>, %arg6: memref<1x8x2xf32, #tpu.memory_space<vmem>>, %arg7: memref<2x8x1152xf32, #tpu.memory_space<vmem>>, %arg8: memref<2x!tpu.dma_semaphore, #tpu.memory_space<semaphore_mem>>, %arg9: memref<8x1xf32, #tpu.memory_space<vmem>>, %arg10: memref<8x1xf32, #tpu.memory_space<vmem>>) attributes {dimension_semantics = [#tpu.dimension_semantics<parallel>, #tpu.dimension_semantics<arbitrary>], iteration_bounds = array<i64: 2, 1>, scalar_prefetch = 0 : i64, scratch_operands = 4 : i64, tpu.core_type = #tpu.core_type<tc>, window_params = [{}, {pipeline_mode = #tpu.pipeline_mode<synchronous>, transform_indices = @transform_1, window_bounds = array<i64: 3, 8, 8>}, {pipeline_mode = #tpu.pipeline_mode<synchronous>, transform_indices = @transform_2, window_bounds = array<i64: 8, 1>}, {transform_indices = @transform_3, window_bounds = array<i64: 1, 8, 1024>}, {transform_indices = @transform_4, window_bounds = array<i64: 1, 8, 2>}]} {
    %c2_i32 = arith.constant 2 : i32
    %c0_i32 = arith.constant 0 : i32
    %0 = arith.cmpi eq, %c2_i32, %c0_i32 : i32
    %c1_i32 = arith.constant 1 : i32
    %1 = arith.select %0, %c1_i32, %c2_i32 : i32
    %2 = arith.remsi %arg1, %1 : i32
    %c0_i32_0 = arith.constant 0 : i32
    %3 = arith.cmpi ne, %2, %c0_i32_0 : i32
    %c0_i32_1 = arith.constant 0 : i32
    %4 = arith.cmpi slt, %2, %c0_i32_1 : i32
    %c0_i32_2 = arith.constant 0 : i32
    %5 = arith.cmpi slt, %1, %c0_i32_2 : i32
    %6 = arith.xori %4, %5 : i1
    %7 = arith.andi %6, %3 : i1
    %8 = arith.addi %2, %1 : i32
    %9 = arith.select %7, %8, %2 : i32
    %c0_i32_3 = arith.constant 0 : i32
    %10 = arith.cmpi eq, %arg1, %c0_i32_3 : i32
    %11 = arith.extui %10 : i1 to i32
    %c0_i32_4 = arith.constant 0 : i32
    %12 = arith.cmpi ne, %11, %c0_i32_4 : i32
    scf.if %12 {
      %c0_i32_48 = arith.constant 0 : i32
      %c0_i32_49 = arith.constant 0 : i32
      %c0_i32_50 = arith.constant 0 : i32
      %c0_i32_51 = arith.constant 0 : i32
      %70 = tpu.memref_slice %arg2[%arg0, %c0_i32_50, %c0_i32_51] : memref<2x8x1152xf32, #tpu.memory_space<any>> -> memref<1x8x1152xf32, #tpu.memory_space<any>>
      %71 = tpu.memref_squeeze %70 : memref<1x8x1152xf32, #tpu.memory_space<any>> -> memref<8x1152xf32, #tpu.memory_space<any>>
      %c0_i32_52 = arith.constant 0 : i32
      %c0_i32_53 = arith.constant 0 : i32
      %72 = tpu.memref_slice %arg7[%c0_i32_48, %c0_i32_52, %c0_i32_53] : memref<2x8x1152xf32, #tpu.memory_space<vmem>> -> memref<1x8x1152xf32, #tpu.memory_space<vmem>>
      %73 = tpu.memref_squeeze %72 : memref<1x8x1152xf32, #tpu.memory_space<vmem>> -> memref<8x1152xf32, #tpu.memory_space<vmem>>
      %74 = tpu.memref_slice %arg8[%c0_i32_49] : memref<2x!tpu.dma_semaphore, #tpu.memory_space<semaphore_mem>> -> memref<1x!tpu.dma_semaphore, #tpu.memory_space<semaphore_mem>>
      %75 = tpu.memref_squeeze %74 : memref<1x!tpu.dma_semaphore, #tpu.memory_space<semaphore_mem>> -> memref<!tpu.dma_semaphore, #tpu.memory_space<semaphore_mem>>
      tpu.enqueue_dma source(%71 : memref<8x1152xf32, #tpu.memory_space<any>>) target(%73 : memref<8x1152xf32, #tpu.memory_space<vmem>>) target_semaphore(%75 : memref<!tpu.dma_semaphore, #tpu.memory_space<semaphore_mem>>)
      %cst_54 = arith.constant 0.000000e+00 : f32
      %76 = vector.broadcast %cst_54 : f32 to vector<8x1xf32>
      %c0_55 = arith.constant 0 : index
      %c0_56 = arith.constant 0 : index
      %77 = vector.load %arg9[%c0_55, %c0_56] : memref<8x1xf32, #tpu.memory_space<vmem>>, vector<8x1xf32>
      tpu.vector_store %arg9[%c0_55, %c0_56], %76 {strides = array<i32>} : memref<8x1xf32, #tpu.memory_space<vmem>>, vector<8x1xf32>,
      %cst_57 = arith.constant 0.000000e+00 : f32
      %78 = vector.broadcast %cst_57 : f32 to vector<8x1xf32>
      %c0_58 = arith.constant 0 : index
      %c0_59 = arith.constant 0 : index
      %79 = vector.load %arg10[%c0_58, %c0_59] : memref<8x1xf32, #tpu.memory_space<vmem>>, vector<8x1xf32>
      tpu.vector_store %arg10[%c0_58, %c0_59], %78 {strides = array<i32>} : memref<8x1xf32, #tpu.memory_space<vmem>>, vector<8x1xf32>,
    } else {
    }
    %c1_i32_5 = arith.constant 1 : i32
    %13 = arith.addi %arg1, %c1_i32_5 : i32
    %c1_i32_6 = arith.constant 1 : i32
    %14 = arith.cmpi slt, %13, %c1_i32_6 : i32
    %15 = arith.extui %14 : i1 to i32
    %c0_i32_7 = arith.constant 0 : i32
    %16 = arith.cmpi ne, %15, %c0_i32_7 : i32
    scf.if %16 {
      %c1_i32_48 = arith.constant 1 : i32
      %70 = arith.addi %arg1, %c1_i32_48 : i32
      %c1_i32_49 = arith.constant 1 : i32
      %71 = arith.subi %c1_i32_49, %9 : i32
      %c1024_i32_50 = arith.constant 1024 : i32
      %72 = arith.muli %70, %c1024_i32_50 : i32
      %c0_i32_51 = arith.constant 0 : i32
      %73 = tpu.memref_slice %arg2[%arg0, %c0_i32_51, %72] : memref<2x8x1152xf32, #tpu.memory_space<any>> -> memref<1x8x1152xf32, #tpu.memory_space<any>>
      %74 = tpu.memref_squeeze %73 : memref<1x8x1152xf32, #tpu.memory_space<any>> -> memref<8x1152xf32, #tpu.memory_space<any>>
      %c0_i32_52 = arith.constant 0 : i32
      %c0_i32_53 = arith.constant 0 : i32
      %75 = tpu.memref_slice %arg7[%71, %c0_i32_52, %c0_i32_53] : memref<2x8x1152xf32, #tpu.memory_space<vmem>> -> memref<1x8x1152xf32, #tpu.memory_space<vmem>>
      %76 = tpu.memref_squeeze %75 : memref<1x8x1152xf32, #tpu.memory_space<vmem>> -> memref<8x1152xf32, #tpu.memory_space<vmem>>
      %77 = tpu.memref_slice %arg8[%71] : memref<2x!tpu.dma_semaphore, #tpu.memory_space<semaphore_mem>> -> memref<1x!tpu.dma_semaphore, #tpu.memory_space<semaphore_mem>>
      %78 = tpu.memref_squeeze %77 : memref<1x!tpu.dma_semaphore, #tpu.memory_space<semaphore_mem>> -> memref<!tpu.dma_semaphore, #tpu.memory_space<semaphore_mem>>
      tpu.enqueue_dma source(%74 : memref<8x1152xf32, #tpu.memory_space<any>>) target(%76 : memref<8x1152xf32, #tpu.memory_space<vmem>>) target_semaphore(%78 : memref<!tpu.dma_semaphore, #tpu.memory_space<semaphore_mem>>)
    } else {
    }
    %c1024_i32 = arith.constant 1024 : i32
    %17 = arith.muli %arg1, %c1024_i32 : i32
    %c0_i32_8 = arith.constant 0 : i32
    %18 = tpu.memref_slice %arg2[%arg0, %c0_i32_8, %17] : memref<2x8x1152xf32, #tpu.memory_space<any>> -> memref<1x8x1152xf32, #tpu.memory_space<any>>
    %19 = tpu.memref_squeeze %18 : memref<1x8x1152xf32, #tpu.memory_space<any>> -> memref<8x1152xf32, #tpu.memory_space<any>>
    %c0_i32_9 = arith.constant 0 : i32
    %c0_i32_10 = arith.constant 0 : i32
    %20 = tpu.memref_slice %arg7[%9, %c0_i32_9, %c0_i32_10] : memref<2x8x1152xf32, #tpu.memory_space<vmem>> -> memref<1x8x1152xf32, #tpu.memory_space<vmem>>
    %21 = tpu.memref_squeeze %20 : memref<1x8x1152xf32, #tpu.memory_space<vmem>> -> memref<8x1152xf32, #tpu.memory_space<vmem>>
    %22 = tpu.memref_slice %arg8[%9] : memref<2x!tpu.dma_semaphore, #tpu.memory_space<semaphore_mem>> -> memref<1x!tpu.dma_semaphore, #tpu.memory_space<semaphore_mem>>
    %23 = tpu.memref_squeeze %22 : memref<1x!tpu.dma_semaphore, #tpu.memory_space<semaphore_mem>> -> memref<!tpu.dma_semaphore, #tpu.memory_space<semaphore_mem>>
    tpu.wait_dma2 semaphore(%23 : memref<!tpu.dma_semaphore, #tpu.memory_space<semaphore_mem>>) src(%19 : memref<8x1152xf32, #tpu.memory_space<any>>) dst(%21 : memref<8x1152xf32, #tpu.memory_space<vmem>>)
    %c0_i32_11 = arith.constant 0 : i32
    %c0_i32_12 = arith.constant 0 : i32
    %24 = tpu.memref_slice %arg7[%9, %c0_i32_11, %c0_i32_12] : memref<2x8x1152xf32, #tpu.memory_space<vmem>> -> memref<1x8x1152xf32, #tpu.memory_space<vmem>>
    %25 = tpu.memref_squeeze %24 : memref<1x8x1152xf32, #tpu.memory_space<vmem>> -> memref<8x1152xf32, #tpu.memory_space<vmem>>
    %c0 = arith.constant 0 : index
    %c0_13 = arith.constant 0 : index
    %26 = vector.load %25[%c0, %c0_13] : memref<8x1152xf32, #tpu.memory_space<vmem>>, vector<8x1024xf32>
    %c0_i32_14 = arith.constant 0 : i32
    %c0_i32_15 = arith.constant 0 : i32
    %27 = tpu.memref_slice %arg7[%9, %c0_i32_14, %c0_i32_15] : memref<2x8x1152xf32, #tpu.memory_space<vmem>> -> memref<1x8x1152xf32, #tpu.memory_space<vmem>>
    %28 = tpu.memref_squeeze %27 : memref<1x8x1152xf32, #tpu.memory_space<vmem>> -> memref<8x1152xf32, #tpu.memory_space<vmem>>
    %c0_16 = arith.constant 0 : index
    %c3 = arith.constant 3 : index
    %29 = vector.load %28[%c0_16, %c3] : memref<8x1152xf32, #tpu.memory_space<vmem>>, vector<8x1024xf32>
    %c0_i32_17 = arith.constant 0 : i32
    %c0_i32_18 = arith.constant 0 : i32
    %30 = tpu.memref_slice %arg7[%9, %c0_i32_17, %c0_i32_18] : memref<2x8x1152xf32, #tpu.memory_space<vmem>> -> memref<1x8x1152xf32, #tpu.memory_space<vmem>>
    %31 = tpu.memref_squeeze %30 : memref<1x8x1152xf32, #tpu.memory_space<vmem>> -> memref<8x1152xf32, #tpu.memory_space<vmem>>
    %c0_19 = arith.constant 0 : index
    %c6 = arith.constant 6 : index
    %32 = vector.load %31[%c0_19, %c6] : memref<8x1152xf32, #tpu.memory_space<vmem>>, vector<8x1024xf32>
    %c0_20 = arith.constant 0 : index
    %c0_21 = arith.constant 0 : index
    %c0_22 = arith.constant 0 : index
    %33 = vector.load %arg3[%c0_20, %c0_21, %c0_22] : memref<3x8x8xf32, #tpu.memory_space<vmem>>, vector<1x8x8xf32>
    %34 = vector.shape_cast %33 : vector<1x8x8xf32> to vector<8x8xf32>
    %cst = arith.constant dense<0.000000e+00> : vector<8x1024xf32>
    %35 = tpu.matmul %34, %26, %cst {dimension_numbers = #tpu.dot_dimension_numbers<[1], [0], [0], [1], [0, 0, 1, 1], [], []>} : vector<8x8xf32>, vector<8x1024xf32>, vector<8x1024xf32> -> vector<8x1024xf32>
    %c1 = arith.constant 1 : index
    %c0_23 = arith.constant 0 : index
    %c0_24 = arith.constant 0 : index
    %36 = vector.load %arg3[%c1, %c0_23, %c0_24] : memref<3x8x8xf32, #tpu.memory_space<vmem>>, vector<1x8x8xf32>
    %37 = vector.shape_cast %36 : vector<1x8x8xf32> to vector<8x8xf32>
    %cst_25 = arith.constant dense<0.000000e+00> : vector<8x1024xf32>
    %38 = tpu.matmul %37, %29, %cst_25 {dimension_numbers = #tpu.dot_dimension_numbers<[1], [0], [0], [1], [0, 0, 1, 1], [], []>} : vector<8x8xf32>, vector<8x1024xf32>, vector<8x1024xf32> -> vector<8x1024xf32>
    %39 = arith.addf %35, %38 : vector<8x1024xf32>
    %c2 = arith.constant 2 : index
    %c0_26 = arith.constant 0 : index
    %c0_27 = arith.constant 0 : index
    %40 = vector.load %arg3[%c2, %c0_26, %c0_27] : memref<3x8x8xf32, #tpu.memory_space<vmem>>, vector<1x8x8xf32>
    %41 = vector.shape_cast %40 : vector<1x8x8xf32> to vector<8x8xf32>
    %cst_28 = arith.constant dense<0.000000e+00> : vector<8x1024xf32>
    %42 = tpu.matmul %41, %32, %cst_28 {dimension_numbers = #tpu.dot_dimension_numbers<[1], [0], [0], [1], [0, 0, 1, 1], [], []>} : vector<8x8xf32>, vector<8x1024xf32>, vector<8x1024xf32> -> vector<8x1024xf32>
    %43 = arith.addf %39, %42 : vector<8x1024xf32>
    %c0_29 = arith.constant 0 : index
    %c0_30 = arith.constant 0 : index
    %44 = vector.load %arg4[%c0_29, %c0_30] : memref<8x1xf32, #tpu.memory_space<vmem>>, vector<8x1xf32>
    %45 = vector.broadcast %44 : vector<8x1xf32> to vector<8x1024xf32>
    %46 = arith.addf %43, %45 : vector<8x1024xf32>
    %47 = arith.addf %46, %29 : vector<8x1024xf32>
    %cst_31 = arith.constant 0.000000e+00 : f32
    %48 = vector.broadcast %cst_31 : f32 to vector<8x1024xf32>
    %49 = arith.cmpf oge, %47, %48 : vector<8x1024xf32>
    %cst_32 = arith.constant 2.000000e-01 : f32
    %50 = vector.broadcast %cst_32 : f32 to vector<8x1024xf32>
    %51 = arith.mulf %50, %47 : vector<8x1024xf32>
    %52 = arith.select %49, %47, %51 : vector<8x1024xi1>, vector<8x1024xf32>
    %c0_33 = arith.constant 0 : index
    %c0_34 = arith.constant 0 : index
    %c0_35 = arith.constant 0 : index
    %53 = vector.load %arg5[%c0_33, %c0_34, %c0_35] : memref<1x8x1024xf32, #tpu.memory_space<vmem>>, vector<1x8x1024xf32>
    %54 = vector.shape_cast %53 : vector<1x8x1024xf32> to vector<8x1024xf32>
    %55 = vector.shape_cast %52 : vector<8x1024xf32> to vector<1x8x1024xf32>
    tpu.vector_store %arg5[%c0_33, %c0_34, %c0_35], %55 {strides = array<i32>} : memref<1x8x1024xf32, #tpu.memory_space<vmem>>, vector<1x8x1024xf32>,
    %c0_36 = arith.constant 0 : index
    %c0_37 = arith.constant 0 : index
    %56 = vector.load %arg9[%c0_36, %c0_37] : memref<8x1xf32, #tpu.memory_space<vmem>>, vector<8x1xf32>
    %cst_38 = arith.constant dense<0.000000e+00> : vector<8xf32>
    %57 = vector.multi_reduction <add>, %52, %cst_38 [1] : vector<8x1024xf32> to vector<8xf32>
    %58 = vector.shape_cast %57 : vector<8xf32> to vector<8x1xf32>
    %59 = arith.addf %56, %58 : vector<8x1xf32>
    %c0_39 = arith.constant 0 : index
    %c0_40 = arith.constant 0 : index
    %60 = vector.load %arg9[%c0_39, %c0_40] : memref<8x1xf32, #tpu.memory_space<vmem>>, vector<8x1xf32>
    tpu.vector_store %arg9[%c0_39, %c0_40], %59 {strides = array<i32>} : memref<8x1xf32, #tpu.memory_space<vmem>>, vector<8x1xf32>,
    %c0_41 = arith.constant 0 : index
    %c0_42 = arith.constant 0 : index
    %61 = vector.load %arg10[%c0_41, %c0_42] : memref<8x1xf32, #tpu.memory_space<vmem>>, vector<8x1xf32>
    %62 = arith.mulf %52, %52 : vector<8x1024xf32>
    %cst_43 = arith.constant dense<0.000000e+00> : vector<8xf32>
    %63 = vector.multi_reduction <add>, %62, %cst_43 [1] : vector<8x1024xf32> to vector<8xf32>
    %64 = vector.shape_cast %63 : vector<8xf32> to vector<8x1xf32>
    %65 = arith.addf %61, %64 : vector<8x1xf32>
    %c0_44 = arith.constant 0 : index
    %c0_45 = arith.constant 0 : index
    %66 = vector.load %arg10[%c0_44, %c0_45] : memref<8x1xf32, #tpu.memory_space<vmem>>, vector<8x1xf32>
    tpu.vector_store %arg10[%c0_44, %c0_45], %65 {strides = array<i32>} : memref<8x1xf32, #tpu.memory_space<vmem>>, vector<8x1xf32>,
    %c0_i32_46 = arith.constant 0 : i32
    %67 = arith.cmpi eq, %arg1, %c0_i32_46 : i32
    %68 = arith.extui %67 : i1 to i32
    %c0_i32_47 = arith.constant 0 : i32
    %69 = arith.cmpi ne, %68, %c0_i32_47 : i32
    scf.if %69 {
      %c0_48 = arith.constant 0 : index
      %c0_49 = arith.constant 0 : index
      %70 = vector.load %arg9[%c0_48, %c0_49] : memref<8x1xf32, #tpu.memory_space<vmem>>, vector<8x1xf32>
      %c0_50 = arith.constant 0 : index
      %c0_51 = arith.constant 0 : index
      %71 = vector.load %arg10[%c0_50, %c0_51] : memref<8x1xf32, #tpu.memory_space<vmem>>, vector<8x1xf32>
      %72 = tpu.concatenate %70, %71 in 1 : vector<8x1xf32>, vector<8x1xf32> -> vector<8x2xf32>
      %c0_52 = arith.constant 0 : index
      %c0_53 = arith.constant 0 : index
      %c0_54 = arith.constant 0 : index
      %73 = vector.load %arg6[%c0_52, %c0_53, %c0_54] : memref<1x8x2xf32, #tpu.memory_space<vmem>>, vector<1x8x2xf32>
      %74 = vector.shape_cast %73 : vector<1x8x2xf32> to vector<8x2xf32>
      %75 = vector.shape_cast %72 : vector<8x2xf32> to vector<1x8x2xf32>
      tpu.vector_store %arg6[%c0_52, %c0_53, %c0_54], %75 {strides = array<i32>} : memref<1x8x2xf32, #tpu.memory_space<vmem>>, vector<1x8x2xf32>,
    } else {
    }
    return
  }
  func.func @transform_1(%arg0: i32, %arg1: i32) -> (i32, i32, i32) {
    %c0_i32 = arith.constant 0 : i32
    %c0_i32_0 = arith.constant 0 : i32
    %c0_i32_1 = arith.constant 0 : i32
    %c0_i32_2 = arith.constant 0 : i32
    return %c0_i32, %c0_i32_0, %c0_i32_1 : i32, i32, i32
  }
  func.func @transform_2(%arg0: i32, %arg1: i32) -> (i32, i32) {
    %c0_i32 = arith.constant 0 : i32
    %c0_i32_0 = arith.constant 0 : i32
    %c0_i32_1 = arith.constant 0 : i32
    return %c0_i32, %c0_i32_0 : i32, i32
  }
  func.func @transform_3(%arg0: i32, %arg1: i32) -> (i32, i32, i32) {
    %c0_i32 = arith.constant 0 : i32
    %c0_i32_0 = arith.constant 0 : i32
    return %arg0, %c0_i32, %arg1 : i32, i32, i32
  }
  func.func @transform_4(%arg0: i32, %arg1: i32) -> (i32, i32, i32) {
    %c0_i32 = arith.constant 0 : i32
    %c0_i32_0 = arith.constant 0 : i32
    %c0_i32_1 = arith.constant 0 : i32
    return %arg0, %c0_i32, %c0_i32_0 : i32, i32, i32
  }
}

</mosaic_0001>

<bundles_post_ra>
// kernel: tpu_custom_call.1
= control target key start
LH: loop header
LB: loop body
LE: loop exit
PB: predicated region body
PF: predicated region fallthrough
CT: control target
= control target key end

     0   :  { %s2057_s0 = inlined_call_operand.hbm [shape: f32[2,8,1152], index: 0, kind: input, shape index: {}]   ;;  %s2058_s1 = inlined_call_operand.hbm [shape: f32[3,8,8], index: 1, kind: input, shape index: {}]   ;;  %s2059_s2 = inlined_call_operand.vmem [shape: f32[8,1], index: 2, kind: input, shape index: {}]   ;;  %s2060_s3 = inlined_call_operand.hbm [shape: f32[2,8,1024], index: 3, kind: output, shape index: {0}]   ;;  %s2061_s4 = inlined_call_operand.vmem [shape: f32[2,8,2], index: 4, kind: output, shape index: {1}]  }
   0x1   :  { %2068 = sst [smem:[#allocation20_spill]] %s2058_s1 }
   0x2   :  { %10 = vsyncpa [#allocation7], 0 }
   0x3   :  { %11 = vsyncpa [#allocation8], 0 }
   0x4   :  { %13 = vsyncpa [#allocation8 + $0x1], 0  ;;  %s1770_s15 = smov 0   ;;  %s1772_s16 = smov 0  }
   0x5   :  { %s1774_s17 = smov 0   ;;  %s1776_s18 = smov 0  }
   0x6   :  { %s1778_s19 = smov 0   ;;  %s1780_s20 = smov 0  }
   0x7 LB: > { %s1473_s21 = sadd.s32 4294967295, %s1733_s20   ;;  %s1474_s22 = sadd.s32 4294967294, %s1733_s20   ;;  %s1733_s20 = sphi %s1780_s20, %s19_s20   ;;  %s1729_s19 = sphi %s1778_s19, %s2086_s19   ;;  %s1725_s18 = sphi %s1776_s18, %s2085_s18   ;;  %s1721_s17 = sphi %s1774_s17, %s2084_s17   ;;  %s1717_s16 = sphi %s1772_s16, %s2083_s16   ;;  %s1713_s15 = sphi %s1770_s15, %s2082_s15  }
   0x8   : > { %s31_s23 = sadd.s32 1, %s1729_s19  ;;  %s82_s24 = sadd.s32 1, %s1721_s17 }
   0x9   : > { %p33_p0 = scmp.ge.s32.totalorder %s31_s23, 2  ;;  %p92_p1 = scmp.ne.s32.totalorder %s1721_s17, %s1717_s16 }
   0xa   : > { %p93_p2 = scmp.eq.s32.totalorder %s1473_s21, 1  ;;  %p98_p3 = scmp.ne.s32.totalorder %s1717_s16, %s1713_s15 }
   0xb   : > { %s2088_s23 = smov (%p33_p0, %s31_s23), 0  ;;  %p99_p5 = scmp.eq.s32.totalorder %s1474_s22, 1 }
   0xc   : > { %2069 = sst [smem:[#allocation19_spill]] %s2088_s23  ;;  %p1810_p4 = por %p93_p2, %p92_p1 }
   0xd   : > { %s77_s26 = ssub.s32 %s1729_s19, %s2088_s23  ;;  %p1475_p6 = scmp.ge.s32.totalorder %s1733_s20, 1 }
   0xe   : > { %s2070_s25 = scalar_select %p1810_p4, 1, 0 }
   0xf   : > { %p80_p7 = scmp.eq.s32.totalorder %s77_s26, 0  ;;  %p1817_p8 = por %p99_p5, %p98_p3 }
  0x10   : > { %p132_p9 = scmp.lt.s32.totalorder %s1733_s20, 3  ;;  %p1829_p11 = scmp.eq.s32.totalorder %s1473_s21, 0 }
  0x11   : > { %s2071_s27 = scalar_select %p1817_p8, 1, 0 }
  0x12   : > { %s1823_s28 = scalar_select %p80_p7, %s1721_s17, %s82_s24  }
  0x13   : > { %p1825_p10 = pnand %p1475_p6, %p132_p9  ;;  %s1735_s5 = smov [#allocation6]  }
  0x14   : > { %s2073_s30 = scalar_select %p1829_p11, 1, 0 }
  0x15   : > { %s2072_s29 = scalar_select %p1825_p10, 1, 0 }
  0x16   : > { %p1528_p12 = pneg %p1825_p10  ;;  %s144_s6 = sshll.u32 %s1735_s5, 4  ;;  %s145_s6 = int_to_ptr.vmem [resolvable:$true] %s144_s6 }
  0x17   : > { %s2075_s1 = sld [smem:[#allocation20_spill]] }
  0x18   : > { %p1837_p13 = pnand %p1829_p11, %p1528_p12 }
  0x1a   : > { %p1599_p1 = pneg %p1837_p13 }
  0x1d   : > { %s1597_s10 = scalar_lea.hbm %s2075_s1, 384 }
  0x1e   : > { %p1598_p0 = scmp.ne.s32.totalorder %s2075_s1, %s1597_s10  ;;  %p1604_p5 = scmp.lt.u32.totalorder %s1597_s10, %s2075_s1 }
  0x20   : > { %p1600_p2 = pnand %p1599_p1, %p1598_p0 }
  0x22   : > { %p1601_p3 = pneg %p1600_p2 }
  0x24   : > { %p1606_p6 = pnand %p1604_p5, %p1601_p3 }
  0x26   : > { %1609 = shalt.err (!%p1606_p6)
}
  0x27   : > { %s1610_s21 = scalar_lea.vmem %s145_s6, 384  ;;  %p1618_p8 = scmp.lt.s32.totalorder %s145_s6, %s145_s6 }
  0x28   : > { %p1611_p7 = scmp.ne.s32.totalorder %s145_s6, %s1610_s21  ;;  %p1619_p4 = scmp.lt.s32.totalorder %s1610_s21, %s1610_s21 }
  0x2a   : > { %p1613_p9 = pnand %p1611_p7, %p1599_p1  ;;  %p1620_p11 = por %p1619_p4, %p1618_p8 }
  0x2c   : > { %p1614_p12 = pneg %p1613_p9 }
  0x2e   : > { %p1621_p10 = pnand %p1620_p11, %p1614_p12 }
  0x30   : > { %1624 = shalt.err (!%p1621_p10)
}
  0x31   : > { %s1736_s22 = smov 128   ;;  %s1737_s24 = smov 8  }
  0x32   : > { %1531 = dma.hbm_to_vmem [thread:$0]  (!%p1837_p13), %s2075_s1, 384, %s145_s6, [#allocation7], %s1736_s22, %s1736_s22, %s1737_s24  }
  0x33   : > { %p2076_p0 = scmp.ne.s32.totalorder %s2072_s29, 0 }
  0x34   : > { %p2077_p2 = scmp.ne.s32.totalorder (!%p2076_p0), %s2073_s30, 0 }
  0x35   : > { %163 = sbr.rel (%p2076_p0) target bundleno = 749 (0x2ed), region = 28 }
  0x3c   : > { %1702 = dma.done.wait (%p2077_p2), [#allocation7], 384  }
  0x3d   : > { %1704 = vsyncadd (%p2077_p2), [#allocation7], 4294966912  ;;  %s2066_s8 = sand.u32 1, %s1717_s16   ;;  %p187_p4 = scmp.lt.s32.totalorder %s1725_s18, 1  ;;  %vm221_vm0 = vcmask 7168   ;;  %v1738_v0 = vmov 0.0  }
  0x3e   : > { %s1867_s7 = sshll.u32 %s2066_s8, 6  ;;  %s1502_s6 = smul.u32 1152, %s1725_s18  ;;  %222 = vst.msk [vmem:[#allocation4] sm:$0xff] %vm221_vm0, %v1738_v0  ;;  %223 = vst.msk [vmem:[#allocation5] sm:$0xff] %vm221_vm0, %v1738_v0 }
  0x3f   : > { %s188_s29 = scalar_select %p187_p4, %s1725_s18, 1 }
  0x40   : > { %s209_s10 = scalar_lea.hbm %s2057_s0, %s1502_s6  ;;  %s1739_s11 = smov [#allocation2]  }
  0x41   : > { %s217_s12 = sshll.u32 %s1739_s11, 4  ;;  %s1480_s13 = sshll.u32 %s188_s29, 3  ;;  %s218_s12 = int_to_ptr.vmem [resolvable:$true] %s217_s12 }
  0x42   : > { %s1881_s22 = scalar_lea.vmem %s2061_s4, %s1480_s13  ;;  %s1625_s24 = scalar_lea.hbm %s209_s10, 1152 }
  0x43   : > { %p1626_p8 = scmp.ne.s32.totalorder %s209_s10, %s1625_s24  ;;  %s1627_s8 = scalar_lea.hbm %s2057_s0, 2304 }
  0x44   : > { %p1628_p10 = scmp.lt.u32.totalorder %s209_s10, %s2057_s0  ;;  %p1629_p11 = scmp.lt.u32.totalorder %s1627_s8, %s1625_s24 }
  0x45   : > { %p1631_p1 = scmp.lt.u32.totalorder %s1625_s24, %s209_s10 }
  0x46   : > { %p1630_p13 = por %p1629_p11, %p1628_p10 }
  0x48   : > { %p1632_p3 = por %p1631_p1, %p1630_p13 }
  0x4a   : > { %p1633_p5 = pnand %p1632_p3, %p1626_p8 }
  0x4c   : > { %1636 = shalt.err (!%p1633_p5)  }
  0x4d   : > { %s1637_s6 = scalar_lea.vmem %s218_s12, 1152  ;;  %s1641_s29 = scalar_lea.vmem %s218_s12, 2304 }
  0x4e   : > { %p1638_p6 = scmp.ne.s32.totalorder %s218_s12, %s1637_s6  ;;  %p1642_p7 = scmp.lt.s32.totalorder %s218_s12, %s218_s12 }
  0x4f   : > { %p1643_p9 = scmp.lt.s32.totalorder %s1641_s29, %s1637_s6 }
  0x51   : > { %p1644_p12 = por %p1643_p9, %p1642_p7 }
  0x53   : > { %p1645_p0 = pnand %p1644_p12, %p1638_p6 }
  0x55   : > { %1648 = shalt.err (!%p1645_p0)  }
  0x56   : > { %220 = dma.hbm_to_vmem [thread:$0]  %s209_s10, 1152, %s218_s12, [#allocation3] }
  0x57   : > { %s1890_s30 = scalar_lea.vmem [#allocation9], %s1867_s7 }
  0x58   : > { %1705 = dma.done.wait [#allocation3], 1152 }
  0x59   : > { %1706 = vsyncadd [#allocation3], 4294966144  ;;  %392 = vmatprep.mubr.f32.mxu0 %v1738_v0  ;;  %463 = vmatprep.mubr.f32.mxu1 %v1738_v0  ;;  %v269_v1 = vld [vmem:[#allocation2 + $0x8] sm:$0xff]  ;;  %v1894_v2 = vld [vmem:[#allocation2] sm:$0xff]  ;;  %s1740_s1 = smov 125   ;;  %s1741_s23 = smov 122  }
  0x5a   : > { %291 = vrot.lane.b32.xlu0 %v269_v1, %s1740_s1  ;;  %289 = vrot.lane.b32.xlu1 %v1894_v2, %s1740_s1  ;;  %v1897_v3 = vld [vmem:[#allocation2 + $0x10] sm:$0xff]  ;;  %v1899_v4 = vld [vmem:[#allocation2 + $0x18] sm:$0xff]  ;;  %v1903_v5 = vld [vmem:[#allocation2 + $0x20] sm:$0xff]  ;;  %v1742_v10 = vmov 0   ;;  %vm307_vm1 = vcmask 1022976   ;;  %vm324_vm2 = vcmask 64512  }
  0x5b   : > { %v273_v6 = vld [vmem:[#allocation2 + $0x28] sm:$0xff]  ;;  %v1906_v7 = vld [vmem:[#allocation2 + $0x30] sm:$0xff]  ;;  %v1908_v8 = vld [vmem:[#allocation2 + $0x38] sm:$0xff]  ;;  %1596 = vset.pattern.permute.xlu0 %v1742_v10  ;;  %vm919_vm3 = vcmask 998400   ;;  %s1505_s9 = sshll.u32 %s1725_s18, 10  ;;  %s1351_s13 = sshll.u32 %s1890_s30, 4  ;;  %s1352_s13 = int_to_ptr.vmem [resolvable:$true] %s1351_s13 }
  0x5c   : > { %v276_v9 = vld [vmem:[#allocation2 + $0x40] sm:$0xff]  ;;  %v279_v17 = vld [vmem:[#allocation6 + $0x8] sm:$0xff]  ;;  %v900_v39 = vld [vmem:[#allocation6 + $0x10] sm:$0xff]  ;;  %s2009_s12 = scalar_lea.hbm %s2060_s3, %s1505_s9  ;;  %s2078_s14 = sand.u32 1, %s1717_s16  }
  0x5d   : > { %v1231_v11 = vld [vmem:[%s2059_s2] sm:$0xff]  ;;  %s1331_s21 = scalar_lea.sflag [#allocation8], %s2078_s14  ;;  %s1649_s24 = scalar_lea.vmem %s1352_s13, 1024 }
  0x5e   : > { %293 = vrot.lane.b32.xlu0 %v1897_v3, %s1740_s1  ;;  %295 = vrot.lane.b32.xlu1 %v1899_v4, %s1740_s1  ;;  %v277_v30 = vld [vmem:[#allocation6] sm:$0xff]  ;;  %p1650_p2 = scmp.ne.s32.totalorder %s1352_s13, %s1649_s24  ;;  %p2079_p4 = scmp.ne.s32.totalorder %s2070_s25, 0 }
  0x5f   : > { %s1743_s26 = smov [#allocation9]  }
  0x60   : > { %p1651_p8 = pnand %p1650_p2, %p2079_p4  ;;  %s1653_s18 = sshll.u32 %s1743_s26, 4  ;;  %s1654_s18 = int_to_ptr.vmem [resolvable:$false] %s1653_s18 }
  0x61   : > { %s1655_s5 = scalar_lea.vmem %s1654_s18, 2048  ;;  %p1656_p11 = scmp.lt.s32.totalorder %s1352_s13, %s1654_s18 }
  0x62   : > { %297 = vrot.lane.b32.xlu0 %v1903_v5, %s1740_s1  ;;  %299 = vrot.lane.b32.xlu1 %v273_v6, %s1740_s1  ;;  %p1652_p10 = pneg %p1651_p8  ;;  %p1657_p13 = scmp.lt.s32.totalorder %s1655_s5, %s1649_s24 }
  0x64   : > { %p1658_p1 = por %p1657_p13, %p1656_p11 }
  0x66   : > { %301 = vrot.lane.b32.xlu0 %v1906_v7, %s1740_s1  ;;  %303 = vrot.lane.b32.xlu1 %v1908_v8, %s1740_s1  ;;  %p1659_p3 = pnand %p1658_p1, %p1652_p10 }
  0x6a   : > { %305 = vrot.lane.b32.xlu0 %v276_v9, %s1740_s1  ;;  %903 = vrot.lane.b32.xlu1 %v269_v1, %s1741_s23 }
  0x6e   : > { %905 = vrot.lane.b32.xlu0 %v1897_v3, %s1741_s23  ;;  %901 = vrot.lane.b32.xlu1 %v1894_v2, %s1741_s23 }
  0x72   : > { %907 = vrot.lane.b32.xlu0 %v1899_v4, %s1741_s23  ;;  %909 = vrot.lane.b32.xlu1 %v1903_v5, %s1741_s23 }
  0x76   : > { %911 = vrot.lane.b32.xlu0 %v273_v6, %s1741_s23  ;;  %913 = vrot.lane.b32.xlu1 %v1906_v7, %s1741_s23 }
  0x7a   : > { %915 = vrot.lane.b32.xlu0 %v1908_v8, %s1741_s23  ;;  %917 = vrot.lane.b32.xlu1 %v276_v9, %s1741_s23 }
  0x7e   : > { %1234 = vperm.xlu0 %1596, %v1231_v11  }
  0xcc   : > { %v292_v12 = vpop.permute.xlu0 %291  ;;  %v290_v13 = vpop.permute.xlu1 %289 }
  0xcd   : > { %v1926_v18 = vsel %vm307_vm1, %v290_v13, %v292_v12 }
  0xd0   : > { %v294_v14 = vpop.permute.xlu0 %293  ;;  %v296_v15 = vpop.permute.xlu1 %295 }
  0xd1   : > { %v1922_v16 = vsel %vm307_vm1, %v292_v12, %v294_v14  ;;  %v1936_v22 = vsel %vm307_vm1, %v294_v14, %v296_v15 }
  0xd2   : > { %328 = vmatprep.subr.mxu0 %v1922_v16 }
  0xd3   : > { %329 = vmatpush1.msra.mxu0 %v1926_v18 }
  0xd4   : > { %v298_v19 = vpop.permute.xlu0 %297  ;;  %v300_v20 = vpop.permute.xlu1 %299  ;;  %1483 = vmatmul.mubr.msk.f32.vlgmr.msra.gmra.mrb[0].mxu0 %vm324_vm2, %v279_v17 }
  0xd5   : > { %v1931_v21 = vsel %vm307_vm1, %v296_v15, %v298_v19  ;;  %534 = vmatprep.mubr.f32.mxu0 %v1738_v0  ;;  %v1945_v26 = vsel %vm307_vm1, %v298_v19, %v300_v20 }
  0xd6   : > { %399 = vmatprep.subr.mxu1 %v1931_v21 }
  0xd7   : > { %400 = vmatpush1.msra.mxu1 %v1936_v22 }
  0xd8   : > { %v302_v23 = vpop.permute.xlu0 %301  ;;  %v304_v24 = vpop.permute.xlu1 %303  ;;  %1484 = vmatmul.mubr.msk.f32.vlgmr.msra.gmra.mrb[0].mxu1 %vm324_vm2, %v279_v17 }
  0xd9   : > { %v1941_v25 = vsel %vm307_vm1, %v300_v20, %v302_v23  ;;  %605 = vmatprep.mubr.f32.mxu1 %v1738_v0  ;;  %v1956_v31 = vsel %vm307_vm1, %v302_v23, %v304_v24 }
  0xda   : > { %470 = vmatprep.subr.mxu0 %v1941_v25 }
  0xdb   : > { %471 = vmatpush1.msra.mxu0 %v1945_v26 }
  0xdc   : > { %v306_v27 = vpop.permute.xlu0 %305  ;;  %1485 = vmatmul.mubr.msk.f32.vlgmr.msra.gmra.mrb[2].mxu0 %vm324_vm2, %v279_v17  ;;  %v904_v28 = vpop.permute.xlu1 %903  ;;  %615 = vmatprep.subr.mxu0 %v269_v1 }
  0xdd   : > { %v1951_v29 = vsel %vm307_vm1, %v304_v24, %v306_v27  ;;  %616 = vmatpush1.msra.mxu0 %v1894_v2  ;;  %679 = vmatprep.mubr.f32.mxu0 %v1738_v0 }
  0xde   : > { %541 = vmatprep.subr.mxu1 %v1951_v29  ;;  %757 = vmatprep.subr.mxu0 %v273_v6 }
  0xdf   : > { %542 = vmatpush1.msra.mxu1 %v1956_v31 }
  0xe0   : > { %v906_v32 = vpop.permute.xlu0 %905  ;;  %1486 = vmatmul.mubr.msk.f32.vlgmr.msra.gmra.mrb[2].mxu1 %vm324_vm2, %v279_v17  ;;  %v902_v33 = vpop.permute.xlu1 %901  ;;  %1487 = vmatmul.mubr.msk.f32.vlgmr.msra.gmra.mrb[0].mxu0 %vm324_vm2, %v277_v30 }
  0xe1   : > { %758 = vmatpush1.msra.mxu0 %v1903_v5  ;;  %686 = vmatprep.subr.mxu1 %v1899_v4  ;;  %v921_v34 = vsel %vm919_vm3, %v904_v28, %v906_v32  ;;  %v920_v35 = vsel %vm919_vm3, %v902_v33, %v904_v28 }
  0xe2   : > { %939 = vmatprep.subr.mxu0 %v921_v34  ;;  %687 = vmatpush1.msra.mxu1 %v1897_v3 }
  0xe3   : > { %750 = vmatprep.mubr.f32.mxu1 %v1738_v0  ;;  %821 = vmatprep.mubr.f32.mxu0 %v1738_v0 }
  0xe4   : > { %v908_v36 = vpop.permute.xlu0 %907  ;;  %v910_v37 = vpop.permute.xlu1 %909  ;;  %1488 = vmatmul.mubr.msk.f32.vlgmr.msra.gmra.mrb[0].mxu1 %vm324_vm2, %v277_v30  ;;  %1489 = vmatmul.mubr.msk.f32.vlgmr.msra.gmra.mrb[2].mxu0 %vm324_vm2, %v277_v30 }
  0xe5   : > { %940 = vmatpush1.msra.mxu0 %v920_v35  ;;  %828 = vmatprep.subr.mxu1 %v1908_v8  ;;  %v923_v38 = vsel %vm919_vm3, %v908_v36, %v910_v37  ;;  %v922_v40 = vsel %vm919_vm3, %v906_v32, %v908_v36 }
  0xe6   : > { %829 = vmatpush1.msra.mxu1 %v1906_v7  ;;  %892 = vmatprep.mubr.f32.mxu1 %v1738_v0 }
  0xe7   : > { %1003 = vmatprep.mubr.f32.mxu0 %v1738_v0  ;;  %1010 = vmatprep.subr.mxu1 %v923_v38 }
  0xe8   : > { %v912_v41 = vpop.permute.xlu0 %911  ;;  %v914_v42 = vpop.permute.xlu1 %913  ;;  %1490 = vmatmul.mubr.msk.f32.vlgmr.msra.gmra.mrb[2].mxu1 %vm324_vm2, %v277_v30  ;;  %1491 = vmatmul.mubr.msk.f32.vlgmr.msra.gmra.mrb[0].mxu0 %vm324_vm2, %v900_v39 }
  0xe9   : > { %v924_v43 = vsel %vm919_vm3, %v910_v37, %v912_v41  ;;  %1011 = vmatpush1.msra.mxu1 %v922_v40  ;;  %v925_v44 = vsel %vm919_vm3, %v912_v41, %v914_v42  ;;  %1074 = vmatprep.mubr.f32.mxu1 %v1738_v0 }
  0xea   : > { %1081 = vmatprep.subr.mxu0 %v925_v44  ;;  %1145 = vmatprep.mubr.f32.mxu0 %v1738_v0 }
  0xeb   : > { %1082 = vmatpush1.msra.mxu0 %v924_v43 }
  0xec   : > { %v916_v45 = vpop.permute.xlu0 %915  ;;  %v918_v46 = vpop.permute.xlu1 %917  ;;  %1492 = vmatmul.mubr.msk.f32.vlgmr.msra.gmra.mrb[0].mxu1 %vm324_vm2, %v900_v39  ;;  %1493 = vmatmul.mubr.msk.f32.vlgmr.msra.gmra.mrb[2].mxu0 %vm324_vm2, %v900_v39 }
  0xed   : > { %v926_v47 = vsel %vm919_vm3, %v914_v42, %v916_v45  ;;  %v927_v48 = vsel %vm919_vm3, %v916_v45, %v918_v46  ;;  %1216 = vmatprep.mubr.f32.mxu1 %v1738_v0 }
  0xee   : > { %1152 = vmatprep.subr.mxu1 %v927_v48  ;;  %v1285_v48 = vld [vmem:[#allocation4] sm:$0xff] }
  0xef   : > { %1153 = vmatpush1.msra.mxu1 %v926_v47 }
  0xf0   : > { %1494 = vmatmul.mubr.msk.f32.vlgmr.msra.gmra.mrb[2].mxu1 %vm324_vm2, %v900_v39 }
  0xfd   : > { %v1235_v49 = vpop.permute.xlu0 %1234 }
 0x1bb   : > { %v1005_v50 = vpop.f32.mrb[0].mxu0 }
 0x1bc   : > { %v1237_v51 = vadd.f32 %v1235_v49, %v1005_v50  ;;  %v1007_v52 = vpop.f32.mrb[1].mxu0  ;;  %v1298_v50 = vld [vmem:[#allocation5] sm:$0xff] }
 0x1bd   : > { %v1238_v53 = vadd.f32 %v1235_v49, %v1007_v52 }
 0x1be   : > { %v1245_v54 = vadd.f32 %v1237_v51, %v1926_v18 }
 0x1bf   : > { %v1246_v55 = vadd.f32 %v1238_v53, %v1922_v16  ;;  %v1076_v56 = vpop.f32.mrb[0].mxu1  ;;  %v1147_v57 = vpop.f32.mrb[2].mxu0 }
 0x1c0   : > { %vm1253_vm4 = vcmp.ge.f32.partialorder %v1245_v54, 0.0  ;;  %v1261_v58 = vmul.f32 0.2, %v1245_v54  ;;  %v1239_v59 = vadd.f32 %v1235_v49, %v1076_v56  ;;  %v1241_v60 = vadd.f32 %v1235_v49, %v1147_v57  ;;  %v1078_v61 = vpop.f32.mrb[1].mxu1  ;;  %v1149_v62 = vpop.f32.mrb[3].mxu0 }
 0x1c1   : > { %vm1254_vm5 = vcmp.ge.f32.partialorder %v1246_v55, 0.0  ;;  %v1262_v63 = vmul.f32 0.2, %v1246_v55  ;;  %v1240_v0 = vadd.f32 %v1235_v49, %v1078_v61  ;;  %v1242_v1 = vadd.f32 %v1235_v49, %v1149_v62 }
 0x1c2   : > { %v1269_v2 = vsel %vm1253_vm4, %v1245_v54, %v1261_v58  ;;  %v1247_v3 = vadd.f32 %v1239_v59, %v1936_v22  ;;  %v1249_v4 = vadd.f32 %v1241_v60, %v1945_v26 }
 0x1c3   : > { %1277 = vst [vmem:[%s1890_s30] sm:$0xff] %v1269_v2  ;;  %v1299_v5 = vmul.f32 %v1269_v2, %v1269_v2  ;;  %v1270_v6 = vsel %vm1254_vm5, %v1246_v55, %v1262_v63  ;;  %v1248_v7 = vadd.f32 %v1240_v0, %v1931_v21  ;;  %v1250_v8 = vadd.f32 %v1242_v1, %v1941_v25  ;;  %v1218_v9 = vpop.f32.mrb[2].mxu1 }
 0x1c4   : > { %1278 = vst [vmem:[%s1890_s30 + $0x8] sm:$0xff] %v1270_v6  ;;  %v1286_v10 = vadd.f32 %v1270_v6, %v1269_v2  ;;  %v1300_v11 = vmul.f32 %v1270_v6, %v1270_v6  ;;  %vm1255_vm6 = vcmp.ge.f32.partialorder %v1247_v3, 0.0  ;;  %v1263_v12 = vmul.f32 0.2, %v1247_v3  ;;  %v1220_v13 = vpop.f32.mrb[3].mxu1 }
 0x1c5   : > { %vm1257_vm7 = vcmp.ge.f32.partialorder %v1249_v4, 0.0  ;;  %v1265_v14 = vmul.f32 0.2, %v1249_v4  ;;  %vm1256_vm8 = vcmp.ge.f32.partialorder %v1248_v7, 0.0  ;;  %v1264_v15 = vmul.f32 0.2, %v1248_v7 }
 0x1c6   : > { %v1307_v16 = vadd.f32 %v1300_v11, %v1299_v5  ;;  %v1271_v17 = vsel %vm1255_vm6, %v1247_v3, %v1263_v12  ;;  %vm1258_vm9 = vcmp.ge.f32.partialorder %v1250_v8, 0.0  ;;  %v1266_v18 = vmul.f32 0.2, %v1250_v8 }
 0x1c7   : > { %1279 = vst [vmem:[%s1890_s30 + $0x10] sm:$0xff] %v1271_v17  ;;  %v1287_v19 = vadd.f32 %v1286_v10, %v1271_v17  ;;  %v1301_v20 = vmul.f32 %v1271_v17, %v1271_v17  ;;  %v1273_v21 = vsel %vm1257_vm7, %v1249_v4, %v1265_v14  ;;  %v1272_v22 = vsel %vm1256_vm8, %v1248_v7, %v1264_v15 }
 0x1c8   : > { %1281 = vst [vmem:[%s1890_s30 + $0x20] sm:$0xff] %v1273_v21  ;;  %1280 = vst [vmem:[%s1890_s30 + $0x18] sm:$0xff] %v1272_v22  ;;  %v1302_v23 = vmul.f32 %v1272_v22, %v1272_v22  ;;  %v1274_v24 = vsel %vm1258_vm9, %v1250_v8, %v1266_v18  ;;  %v1243_v25 = vadd.f32 %v1235_v49, %v1218_v9 }
 0x1c9   : > { %v1308_v26 = vadd.f32 %v1307_v16, %v1301_v20  ;;  %v1288_v27 = vadd.f32 %v1287_v19, %v1272_v22  ;;  %1282 = vst [vmem:[%s1890_s30 + $0x28] sm:$0xff] %v1274_v24  ;;  %v1244_v28 = vadd.f32 %v1235_v49, %v1220_v13  ;;  %v1303_v32 = vmul.f32 %v1273_v21, %v1273_v21 }
 0x1ca   : > { %v1251_v30 = vadd.f32 %v1243_v25, %v1956_v31  ;;  %v1304_v37 = vmul.f32 %v1274_v24, %v1274_v24 }
 0x1cb   : > { %v1252_v33 = vadd.f32 %v1244_v28, %v1951_v29  ;;  %v1289_v34 = vadd.f32 %v1288_v27, %v1273_v21  ;;  %v1309_v35 = vadd.f32 %v1308_v26, %v1302_v23 }
 0x1cc   : > { %vm1259_vm10 = vcmp.ge.f32.partialorder %v1251_v30, 0.0  ;;  %v1267_v36 = vmul.f32 0.2, %v1251_v30 }
 0x1cd   : > { %v1268_v38 = vmul.f32 0.2, %v1252_v33  ;;  %vm1260_vm11 = vcmp.ge.f32.partialorder %v1252_v33, 0.0  ;;  %v1290_v39 = vadd.f32 %v1289_v34, %v1274_v24  ;;  %v1310_v40 = vadd.f32 %v1309_v35, %v1303_v32 }
 0x1ce   : > { %v1275_v41 = vsel %vm1259_vm10, %v1251_v30, %v1267_v36 }
 0x1cf   : > { %v1276_v42 = vsel %vm1260_vm11, %v1252_v33, %v1268_v38  ;;  %1283 = vst [vmem:[%s1890_s30 + $0x30] sm:$0xff] %v1275_v41  ;;  %v1291_v43 = vadd.f32 %v1290_v39, %v1275_v41  ;;  %v1305_v44 = vmul.f32 %v1275_v41, %v1275_v41  ;;  %v1311_v31 = vadd.f32 %v1310_v40, %v1304_v37 }
 0x1d0   : > { %1284 = vst [vmem:[%s1890_s30 + $0x38] sm:$0xff] %v1276_v42  ;;  %v1306_v45 = vmul.f32 %v1276_v42, %v1276_v42 }
 0x1d1   : > { %v1292_v29 = vadd.f32 %v1291_v43, %v1276_v42  ;;  %v1312_v46 = vadd.f32 %v1311_v31, %v1305_v44 }
 0x1d3   : > { %1293 = vadd.xlane.f32.xlu0 %v1292_v29  ;;  %v1313_v47 = vadd.f32 %v1312_v46, %v1306_v45 }
 0x1d5   : > { %1314 = vadd.xlane.f32.xlu1 %v1313_v47 }
 0x260   : > { %v1294_v49 = vpop.xlane.xlu0 %1293 }
 0x261   : > { %v1295_v51 = vadd.f32 %v1294_v49, %v1285_v48 }
 0x262   : > { %v1315_v52 = vpop.xlane.xlu1 %1314 }
 0x263   : > { %1297 = vst.msk [vmem:[#allocation4] sm:$0xff] %vm221_vm0, %v1295_v51  ;;  %v1316_v53 = vadd.f32 %v1315_v52, %v1298_v50 }
 0x264   : > { %1662 = shalt.err (!%p1659_p3)
}
 0x265   : > { %s1663_s6 = scalar_lea.hbm %s2009_s12, 1024  ;;  %s1667_s1 = scalar_lea.hbm %s2060_s3, 2048 }
 0x266   : > { %p1664_p5 = scmp.ne.s32.totalorder %s2009_s12, %s1663_s6  ;;  %p1668_p9 = scmp.lt.u32.totalorder %s2009_s12, %s2060_s3 }
 0x267   : > { %p1669_p12 = scmp.lt.u32.totalorder %s1667_s1, %s1663_s6  ;;  %p1671_p2 = scmp.lt.u32.totalorder %s1663_s6, %s2009_s12 }
 0x268   : > { %p1665_p6 = pnand %p1664_p5, %p2079_p4 }
 0x269   : > { %p1670_p0 = por %p1669_p12, %p1668_p9 }
 0x26a   : > { %p1666_p7 = pneg %p1665_p6 }
 0x26b   : > { %p1672_p8 = por %p1671_p2, %p1670_p0 }
 0x26d   : > { %p1673_p10 = pnand %p1672_p8, %p1666_p7 }
 0x26f   : > { %1676 = shalt.err (!%p1673_p10)
}
 0x270   : > { %1526 = dma.vmem_to_hbm [thread:$0]  (%p2079_p4), %s1352_s13, 1024, %s2009_s12, %s1331_s21   ;;  %1317 = vst.msk [vmem:[#allocation5] sm:$0xff] %vm221_vm0, %v1316_v53  ;;  %vm1328_vm12 = vcmask 15360   ;;  %v1321_v56 = vld [vmem:[#allocation4] sm:$0xff] }
 0x271   : > { %s1744_s7 = smov 1  }
 0x277   : > { %v1322_v54 = vld [vmem:[#allocation5] sm:$0xff] }
 0x278   : > { %1324 = vrot.lane.b32.xlu1 %v1322_v54, %s1744_s7 }
 0x2ea   : > { %v1325_v55 = vpop.permute.xlu1 %1324 }
 0x2eb   : > { %v1327_v57 = vsel %vm221_vm0, %v1321_v56, %v1325_v55 }
 0x2ec   : > { %1329 = vst.msk [vmem:[%s1881_s22] sm:$0xff] %vm1328_vm12, %v1327_v57 }
 0x2ed PF: > { %p1538_p11 = scmp.ge.s32.totalorder %s1733_s20, 2  ;;  %s1366_s25 = sand.u32 1, %s1713_s15  }
 0x2ee   : > { %p2080_p13 = scmp.ne.s32.totalorder %s2071_s27, 0  ;;  %s1367_s9 = scalar_lea.sflag [#allocation8], %s1366_s25 }
 0x2f0   : > { %p1533_p1 = pnand %p1538_p11, %p2080_p13 }
 0x2f2   : > { %1708 = dma.done.wait (!%p1533_p1), %s1367_s9, 1024  }
 0x2f3   : > { %1710 = vsyncadd (!%p1533_p1), %s1367_s9, 4294966272  ;;  %s19_s20 = sadd.s32 1, %s1733_s20   ;;  %s2081_s10 = sld [smem:[#allocation19_spill]] }
 0x2f4   : > { %p16_p4 = scmp.ge.s32.totalorder %s19_s20, 4   ;;  %s2082_s15 = smov %s1717_s16 }
 0x2f5   : > { %s2083_s16 = smov %s1721_s17  ;;  %s2084_s17 = smov %s1823_s28 }
 0x2f6   : > { %s2085_s18 = smov %s1729_s19  ;;  %18 = sbr.rel (!%p16_p4) target bundleno = 7 (0x7), region = 106 }
 0x2f9   : > { %s2086_s19 = smov %s2081_s10 }
 0x2fd   :  { %1379 = vsyncpa [#allocation7], 1 }
 0x2fe   :  { %1381 = vsyncpa [#allocation7 + $0x1], 1 }
 0x2ff   :  { %1382 = vsyncpa [#allocation8], 1 }
 0x300   :  { %1384 = vsyncpa [#allocation8 + $0x1], 1 }
 0x301   :  { %1385 = vsyncmov [#allocation3] }
 0x304   :  { %s1386_s27 = vpop.sfrf %1385 }
 0x305   :  { %p1500_p3 = scmp.ne.s32.totalorder %s1386_s27, 0 }
 0x307   :  { %1390 = shalt.err (%p1500_p3)  }
 0x308   :  { %1392 = vsyncmov [#allocation3 + $0x1] }
 0x30b   :  { %s1393_s22 = vpop.sfrf %1392 }
 0x30c   :  { %p1501_p5 = scmp.ne.s32.totalorder %s1393_s22, 0 }
 0x30e   :  { %1397 = shalt.err (%p1501_p5)  }

</bundles_post_ra>
